<compile_context>
chip_gen: v7x
topology: tpu7x:2x2x1
jax: 0.10.0
libtpu: 0.0.40
codegen_flags: <defaults>
</compile_context>

<pallas_src>
import functools

import jax
import jax.numpy as jnp
from jax.experimental import pallas as pl
from jax.experimental.pallas import tpu as pltpu


# ---------------------------------------------------------------------------
# Packed-parameter layout constants (module hard-codes 128/32/8/1 widths).
# ---------------------------------------------------------------------------
_C1, _C2, _C3 = 128, 32, 8            # hidden widths of conv1_1/1_2/1_3
_CHUNK = 256                          # in-kernel pixel sub-chunk (lane dim)

# bf16 weight slab: rows hold transposed weights, sublane-aligned starts.
_W1_R, _W2_R, _W3_R, _W_ROWS = 0, 128, 160, 176
# f32 bias slab (lane-replicated to _CHUNK): biases + conv1_4 weight column.
_B1_R, _B2_R, _B3_R, _B4_R, _W4_R, _B_ROWS = 0, 128, 160, 168, 176, 184

_VMEM_X_BUDGET = 8 * 1024 * 1024      # bytes allowed for the 2x-buffered x tile


def _pixel_weight_kernel(x_ref, w_ref, b_ref, o_ref, *, act_bf16):
    """x_ref: (1, Cin, tm) producer dtype; w_ref: (176, LW) bf16;
    b_ref: (184, _CHUNK) f32 (lane-replicated); o_ref: (1, 1, tm) f32."""
    cin = x_ref.shape[1]
    tm = x_ref.shape[2]
    chunk = min(_CHUNK, tm)
    act_dtype = jnp.bfloat16 if act_bf16 else jnp.float32

    # Resident parameters: sliced once per grid step (never re-DMA'd).
    w1 = w_ref[_W1_R:_W1_R + _C1, 0:cin]     # (128, Cin)  bf16
    w2 = w_ref[_W2_R:_W2_R + _C2, 0:_C1]     # (32, 128)   bf16
    w3 = w_ref[_W3_R:_W3_R + _C3, 0:_C2]     # (8, 32)     bf16

    def chunk_body(j0):
        # Per-chunk bf16 cast (x arrives in producer dtype; only MXU operands
        # need bf16 — no wrapper-side HBM round-trip).
        x = x_ref[0, :, pl.ds(j0, chunk)].astype(jnp.bfloat16)   # (Cin, chunk)

        # Lane-replicated constants: plain VMEM loads, no broadcast_in_dim.
        b1 = b_ref[_B1_R:_B1_R + _C1, 0:chunk]                   # (128, chunk) f32
        b2 = b_ref[_B2_R:_B2_R + _C2, 0:chunk]                   # (32, chunk)
        b3 = b_ref[_B3_R:_B3_R + _C3, 0:chunk]                   # (8, chunk)
        b4 = b_ref[_B4_R:_B4_R + 1, 0:chunk]                     # (1, chunk)
        w4 = b_ref[_W4_R:_W4_R + _C3, 0:chunk]                   # (8, chunk)

        # layer 1: 1x1 conv (Cin -> 128) + folded BN + ReLU   (MXU, lane-dense)
        h = jnp.dot(w1, x, preferred_element_type=jnp.float32) + b1
        h = jnp.maximum(h.astype(act_dtype), 0.0)                # (128, chunk)

        # layer 2: 128 -> 32
        h = jnp.dot(w2, h.astype(jnp.bfloat16),
                    preferred_element_type=jnp.float32) + b2
        h = jnp.maximum(h.astype(act_dtype), 0.0)                # (32, chunk)

        # layer 3: 32 -> 8  (f32 epilogue: tiny, and keeps the conv1_4 input
        # exactly f32 like the PyTorch module)
        h = jnp.dot(w3, h.astype(jnp.bfloat16),
                    preferred_element_type=jnp.float32) + b3
        h = jnp.maximum(h, 0.0)                                  # (8, chunk) f32

        # layer 4: 8 -> 1 on the VPU/XLU (broadcast-free mul + sublane reduce);
        # keeps the tiny M=1/K=8 matmul off the MXU.
        h4 = jnp.sum(w4 * h, axis=0, keepdims=True) + b4         # (1, chunk) f32
        h4 = jnp.maximum(h4, 0.0)

        o_ref[0, :, pl.ds(j0, chunk)] = h4.astype(o_ref.dtype)

    n_chunks = tm // chunk
    n_pairs = n_chunks // 2
    if n_pairs > 0:
        # Manual unroll-by-2: two chunk bodies per loop step give the scheduler
        # cross-chunk visibility without full-unroll vreg pressure.
        @pl.loop(0, n_pairs)
        def _(p):
            j0 = pl.multiple_of(p * (2 * chunk), 2 * chunk)
            chunk_body(j0)
            chunk_body(j0 + chunk)
    if n_chunks % 2 == 1:
        chunk_body((n_chunks - 1) * chunk)   # static leftover chunk


def _default_act_bf16():
    # v5e/v5p have no bf16 VALU -> keep the epilogue in f32 there.
    try:
        kind = jax.devices()[0].device_kind.lower()
        return "v5" not in kind
    except Exception:
        return True


def pixel_weight_forward(x_nchw, packed_params, *, tm=8192, act_bf16=None):
    """x_nchw: (..., Cin, H, W) with Cin = 2*channel. Returns (B, 1, H, W) f32."""
    w_slab, b_slab = packed_params
    cin = x_nchw.shape[-3]
    h, w = x_nchw.shape[-2], x_nchw.shape[-1]

    # x.view(-1, C, H, W) -> (B, Cin, H*W); NCHW consumed directly, no transpose,
    # no cast, no pad: the kernel casts per chunk and Pallas masks the partial
    # last block's writeback.
    x = x_nchw.reshape(-1, cin, h * w)
    b = x.shape[0]
    hw = h * w

    if act_bf16 is None:
        act_bf16 = _default_act_bf16()

    # Pixel tile: as large as the VMEM budget for the double-buffered x tile
    # allows, rounded to _CHUNK, never exceeding the pixel count.
    itemsize = x.dtype.itemsize
    tm_cap = max(_CHUNK, (_VMEM_X_BUDGET // (2 * cin * itemsize)) // _CHUNK * _CHUNK)
    if hw <= _CHUNK:
        tm_eff = hw                       # single block equal to the full dim
    else:
        tm_eff = max(_CHUNK, min(tm, tm_cap, (hw // _CHUNK) * _CHUNK))
    n_j = pl.cdiv(hw, tm_eff)
    # v7x megacore: when B == 1, keep >= 2 grid steps so both TCs get work.
    if b == 1 and n_j == 1 and tm_eff >= 2 * _CHUNK:
        tm_eff = pl.cdiv(pl.cdiv(hw, 2), _CHUNK) * _CHUNK
        n_j = pl.cdiv(hw, tm_eff)

    kernel = functools.partial(_pixel_weight_kernel, act_bf16=act_bf16)

    out = pl.pallas_call(
        kernel,
        out_shape=jax.ShapeDtypeStruct((b, 1, hw), jnp.float32),
        grid_spec=pltpu.PrefetchScalarGridSpec(
            num_scalar_prefetch=0,
            grid=(b, n_j),
            in_specs=[
                pl.BlockSpec((1, cin, tm_eff), lambda i, j: (i, 0, j)),  # x tile
                pl.BlockSpec(w_slab.shape, lambda i, j: (0, 0)),         # resident weights
                pl.BlockSpec(b_slab.shape, lambda i, j: (0, 0)),         # resident biases
            ],
            out_specs=pl.BlockSpec((1, 1, tm_eff), lambda i, j: (i, 0, j)),
        ),
        compiler_params=pltpu.CompilerParams(
            dimension_semantics=("parallel", "parallel")),
    )(x, w_slab, b_slab)

    return out.reshape(b, 1, h, w)


# ---------------------------------------------------------------------------
# Parameter construction (PyTorch-equivalent init, eval-mode BN folding).
# ---------------------------------------------------------------------------
def _fold_bn(w, b, gamma, beta, mean, var, eps=1e-5):
    """Fold eval-mode BatchNorm into a (Cin, Cout) weight and (1, Cout) bias."""
    scale = gamma / jnp.sqrt(var + eps)
    w_f = w * scale[None, :]
    b_f = (b - mean) * scale + beta
    return w_f, b_f[None, :]


def make_params(channel, key):
    """Deterministic synthetic parameters matching PixelWeightLayer(channel).
    Returns list of (w (Cin, Cout) f32, b (1, Cout) f32) per layer, BN folded."""
    cin = channel * 2
    dims = [(cin, _C1), (_C1, _C2), (_C2, _C3), (_C3, 1)]
    keys = jax.random.split(key, 2 * len(dims))
    params = []
    for li, (ci, co) in enumerate(dims):
        bound = 1.0 / (ci ** 0.5)  # PyTorch Conv2d default init range
        w = jax.random.uniform(keys[2 * li], (ci, co), jnp.float32, -bound, bound)
        bias = jax.random.uniform(keys[2 * li + 1], (co,), jnp.float32, -bound, bound)
        if li < 3:
            # BatchNorm2d init: gamma=1, beta=0, running_mean=0, running_var=1
            gamma = jnp.ones((co,), jnp.float32)
            beta = jnp.zeros((co,), jnp.float32)
            mean = jnp.zeros((co,), jnp.float32)
            var = jnp.ones((co,), jnp.float32)
            w, b2d = _fold_bn(w, bias, gamma, beta, mean, var)
            params.append((w, b2d))
        else:
            params.append((w, bias[None, :]))
    return params


def pack_params(layer_params):
    """Pack per-layer params into one bf16 weight slab and one lane-replicated
    f32 bias slab (so the kernel never emits a broadcast)."""
    (w1, b1), (w2, b2), (w3, b3), (w4, b4) = layer_params
    cin = w1.shape[0]
    assert w1.shape[1] == _C1 and w2.shape == (_C1, _C2)
    assert w3.shape == (_C2, _C3) and w4.shape == (_C3, 1)

    lane_w = max(128, pl.cdiv(cin, 128) * 128)
    w_slab = jnp.zeros((_W_ROWS, lane_w), jnp.float32)
    w_slab = w_slab.at[_W1_R:_W1_R + _C1, 0:cin].set(w1.T)
    w_slab = w_slab.at[_W2_R:_W2_R + _C2, 0:_C1].set(w2.T)
    w_slab = w_slab.at[_W3_R:_W3_R + _C3, 0:_C2].set(w3.T)
    w_slab = w_slab.astype(jnp.bfloat16)

    col = jnp.zeros((_B_ROWS,), jnp.float32)
    col = col.at[_B1_R:_B1_R + _C1].set(b1.reshape(-1))
    col = col.at[_B2_R:_B2_R + _C2].set(b2.reshape(-1))
    col = col.at[_B3_R:_B3_R + _C3].set(b3.reshape(-1))
    col = col.at[_B4_R:_B4_R + 1].set(b4.reshape(-1))
    col = col.at[_W4_R:_W4_R + _C3].set(w4.reshape(-1))   # conv1_4 weight (f32)
    b_slab = jnp.asarray(jnp.broadcast_to(col[:, None], (_B_ROWS, _CHUNK)))
    return w_slab, b_slab


# ---------------------------------------------------------------------------
# Pure-JAX reference mirroring the kernel numerics (bf16 MXU operands,
# f32 bias adds, f32 layers 3-4).
# ---------------------------------------------------------------------------
def _reference(x_nchw, layer_params):
    (w1, b1), (w2, b2), (w3, b3), (w4, b4) = layer_params
    cin = x_nchw.shape[-3]
    hh, ww = x_nchw.shape[-2], x_nchw.shape[-1]
    x = x_nchw.reshape(-1, cin, hh, ww)
    b = x.shape[0]
    xf = jnp.transpose(x, (0, 2, 3, 1)).reshape(-1, cin)

    bf = lambda a: a.astype(jnp.bfloat16).astype(jnp.float32)
    h = jnp.maximum(bf(xf) @ bf(w1) + b1, 0.0)
    h = jnp.maximum(bf(h) @ bf(w2) + b2, 0.0)
    h = jnp.maximum(bf(h) @ bf(w3) + b3, 0.0)
    h = jnp.maximum(h @ w4 + b4, 0.0)           # layer 4 stays f32 (as in kernel)
    return jnp.transpose(h.reshape(b, hh, ww, 1), (0, 3, 1, 2))


if __name__ == "__main__":
    channel = 4
    B, H, W = 2, 16, 16
    Cin = channel * 2  # conv1_1 expects channel*2 input channels

    key = jax.random.PRNGKey(0)
    kx, kp = jax.random.split(key)
    x = jax.random.normal(kx, (B, Cin, H, W), jnp.float32)

    layer_params = make_params(channel, kp)
    packed = pack_params(layer_params)

    out = pixel_weight_forward(x, packed)
    out = jax.block_until_ready(out)

    ref = _reference(x, layer_params)
    assert out.shape == (B, 1, H, W), out.shape
    assert jnp.allclose(out, ref, atol=5e-3, rtol=5e-3), "mismatch vs reference"

    print("KERNEL_OK")
</pallas_src>

<mosaic_0001>
module attributes {stable_mosaic.version = 11 : i64} {
  func.func @_pixel_weight_kernel(%arg0: i32, %arg1: i32, %arg2: memref<1x8x256xf32, #tpu.memory_space<vmem>>, %arg3: memref<176x128xbf16, #tpu.memory_space<vmem>>, %arg4: memref<184x256xf32, #tpu.memory_space<vmem>>, %arg5: memref<1x1x256xf32, #tpu.memory_space<vmem>>) attributes {dimension_semantics = [#tpu.dimension_semantics<parallel>, #tpu.dimension_semantics<parallel>], iteration_bounds = array<i64: 2, 1>, scalar_prefetch = 0 : i64, scratch_operands = 0 : i64, tpu.core_type = #tpu.core_type<tc>, window_params = [{transform_indices = @transform_0, window_bounds = array<i64: 1, 8, 256>}, {pipeline_mode = #tpu.pipeline_mode<synchronous>, transform_indices = @transform_1, window_bounds = array<i64: 176, 128>}, {pipeline_mode = #tpu.pipeline_mode<synchronous>, transform_indices = @transform_2, window_bounds = array<i64: 184, 256>}, {transform_indices = @transform_3, window_bounds = array<i64: 1, 1, 256>}]} {
    %c0 = arith.constant 0 : index
    %c0_0 = arith.constant 0 : index
    %0 = vector.load %arg3[%c0, %c0_0] : memref<176x128xbf16, #tpu.memory_space<vmem>>, vector<128x8xbf16>
    %c128 = arith.constant 128 : index
    %c0_1 = arith.constant 0 : index
    %1 = vector.load %arg3[%c128, %c0_1] : memref<176x128xbf16, #tpu.memory_space<vmem>>, vector<32x128xbf16>
    %c160 = arith.constant 160 : index
    %c0_2 = arith.constant 0 : index
    %2 = vector.load %arg3[%c160, %c0_2] : memref<176x128xbf16, #tpu.memory_space<vmem>>, vector<8x32xbf16>
    %c0_3 = arith.constant 0 : index
    %c0_4 = arith.constant 0 : index
    %c0_5 = arith.constant 0 : index
    %3 = vector.load %arg2[%c0_3, %c0_4, %c0_5] : memref<1x8x256xf32, #tpu.memory_space<vmem>>, vector<1x8x256xf32>
    %4 = vector.shape_cast %3 : vector<1x8x256xf32> to vector<8x256xf32>
    %5 = arith.truncf %4 : vector<8x256xf32> to vector<8x256xbf16>
    %c0_6 = arith.constant 0 : index
    %c0_7 = arith.constant 0 : index
    %6 = vector.load %arg4[%c0_6, %c0_7] : memref<184x256xf32, #tpu.memory_space<vmem>>, vector<128x256xf32>
    %c128_8 = arith.constant 128 : index
    %c0_9 = arith.constant 0 : index
    %7 = vector.load %arg4[%c128_8, %c0_9] : memref<184x256xf32, #tpu.memory_space<vmem>>, vector<32x256xf32>
    %c160_10 = arith.constant 160 : index
    %c0_11 = arith.constant 0 : index
    %8 = vector.load %arg4[%c160_10, %c0_11] : memref<184x256xf32, #tpu.memory_space<vmem>>, vector<8x256xf32>
    %c168 = arith.constant 168 : index
    %c0_12 = arith.constant 0 : index
    %9 = vector.load %arg4[%c168, %c0_12] : memref<184x256xf32, #tpu.memory_space<vmem>>, vector<1x256xf32>
    %c176 = arith.constant 176 : index
    %c0_13 = arith.constant 0 : index
    %10 = vector.load %arg4[%c176, %c0_13] : memref<184x256xf32, #tpu.memory_space<vmem>>, vector<8x256xf32>
    %cst = arith.constant dense<0.000000e+00> : vector<128x256xf32>
    %11 = tpu.matmul %0, %5, %cst {dimension_numbers = #tpu.dot_dimension_numbers<[1], [0], [0], [1], [0, 0, 1, 1], [], []>} : vector<128x8xbf16>, vector<8x256xbf16>, vector<128x256xf32> -> vector<128x256xf32>
    %12 = arith.addf %11, %6 : vector<128x256xf32>
    %13 = arith.truncf %12 : vector<128x256xf32> to vector<128x256xbf16>
    %cst_14 = arith.constant 0.000000e+00 : bf16
    %14 = vector.broadcast %cst_14 : bf16 to vector<128x256xbf16>
    %15 = arith.maximumf %13, %14 : vector<128x256xbf16>
    %cst_15 = arith.constant dense<0.000000e+00> : vector<32x256xf32>
    %16 = tpu.matmul %1, %15, %cst_15 {dimension_numbers = #tpu.dot_dimension_numbers<[1], [0], [0], [1], [0, 0, 1, 1], [], []>} : vector<32x128xbf16>, vector<128x256xbf16>, vector<32x256xf32> -> vector<32x256xf32>
    %17 = arith.addf %16, %7 : vector<32x256xf32>
    %18 = arith.truncf %17 : vector<32x256xf32> to vector<32x256xbf16>
    %cst_16 = arith.constant 0.000000e+00 : bf16
    %19 = vector.broadcast %cst_16 : bf16 to vector<32x256xbf16>
    %20 = arith.maximumf %18, %19 : vector<32x256xbf16>
    %cst_17 = arith.constant dense<0.000000e+00> : vector<8x256xf32>
    %21 = tpu.matmul %2, %20, %cst_17 {dimension_numbers = #tpu.dot_dimension_numbers<[1], [0], [0], [1], [0, 0, 1, 1], [], []>} : vector<8x32xbf16>, vector<32x256xbf16>, vector<8x256xf32> -> vector<8x256xf32>
    %22 = arith.addf %21, %8 : vector<8x256xf32>
    %cst_18 = arith.constant 0.000000e+00 : f32
    %23 = vector.broadcast %cst_18 : f32 to vector<8x256xf32>
    %24 = arith.maximumf %22, %23 : vector<8x256xf32>
    %25 = arith.mulf %10, %24 : vector<8x256xf32>
    %cst_19 = arith.constant dense<0.000000e+00> : vector<256xf32>
    %26 = vector.multi_reduction <add>, %25, %cst_19 [0] : vector<8x256xf32> to vector<256xf32>
    %27 = vector.shape_cast %26 : vector<256xf32> to vector<1x256xf32>
    %28 = arith.addf %27, %9 : vector<1x256xf32>
    %cst_20 = arith.constant 0.000000e+00 : f32
    %29 = vector.broadcast %cst_20 : f32 to vector<1x256xf32>
    %30 = arith.maximumf %28, %29 : vector<1x256xf32>
    %c0_21 = arith.constant 0 : index
    %c0_22 = arith.constant 0 : index
    %c0_23 = arith.constant 0 : index
    %31 = vector.load %arg5[%c0_21, %c0_22, %c0_23] : memref<1x1x256xf32, #tpu.memory_space<vmem>>, vector<1x1x256xf32>
    %32 = vector.shape_cast %31 : vector<1x1x256xf32> to vector<1x256xf32>
    %33 = vector.shape_cast %30 : vector<1x256xf32> to vector<1x1x256xf32>
    tpu.vector_store %arg5[%c0_21, %c0_22, %c0_23], %33 {strides = array<i32>} : memref<1x1x256xf32, #tpu.memory_space<vmem>>, vector<1x1x256xf32>,
    return
  }
  func.func @transform_0(%arg0: i32, %arg1: i32) -> (i32, i32, i32) {
    %c0_i32 = arith.constant 0 : i32
    %c0_i32_0 = arith.constant 0 : i32
    return %arg0, %c0_i32, %arg1 : i32, i32, i32
  }
  func.func @transform_1(%arg0: i32, %arg1: i32) -> (i32, i32) {
    %c0_i32 = arith.constant 0 : i32
    %c0_i32_0 = arith.constant 0 : i32
    %c0_i32_1 = arith.constant 0 : i32
    return %c0_i32, %c0_i32_0 : i32, i32
  }
  func.func @transform_2(%arg0: i32, %arg1: i32) -> (i32, i32) {
    %c0_i32 = arith.constant 0 : i32
    %c0_i32_0 = arith.constant 0 : i32
    %c0_i32_1 = arith.constant 0 : i32
    return %c0_i32, %c0_i32_0 : i32, i32
  }
  func.func @transform_3(%arg0: i32, %arg1: i32) -> (i32, i32, i32) {
    %c0_i32 = arith.constant 0 : i32
    %c0_i32_0 = arith.constant 0 : i32
    return %arg0, %c0_i32, %arg1 : i32, i32, i32
  }
}

</mosaic_0001>

<bundles_post_ra>
// kernel: tpu_custom_call.1
= control target key start
LH: loop header
LB: loop body
LE: loop exit
PB: predicated region body
PF: predicated region fallthrough
CT: control target
= control target key end

     0   :  { %8 = vsyncpa [#allocation3], 0  ;;  %s1451_s0 = inlined_call_operand.hbm [shape: f32[2,8,256], index: 0, kind: input, shape index: {}]   ;;  %s1452_s1 = inlined_call_operand.hbm [shape: bf16[176,128], index: 1, kind: input, shape index: {}]   ;;  %s1453_s2 = inlined_call_operand.hbm [shape: f32[184,256], index: 2, kind: input, shape index: {}]   ;;  %s1454_s3 = inlined_call_operand.hbm [shape: f32[2,1,256], index: 3, kind: output, shape index: {}]  }
   0x1   :  { %10 = vsyncpa [#allocation3 + $0x1], 0 }
   0x2   :  { %11 = vsyncpa [#allocation6], 0 }
   0x3   :  { %12 = vsyncpa [#allocation4], 0 }
   0x4   :  { %14 = vsyncpa [#allocation4 + $0x1], 0  ;;  %s1161_s12 = smov 0   ;;  %s1163_s13 = smov 0  }
   0x5   :  { %s1165_s14 = smov 0   ;;  %s1167_s15 = smov 0  }
   0x6   :  { %s1169_s16 = smov 0   ;;  %s1171_s17 = smov 0  }
   0x7 LB: > { %s817_s18 = sadd.s32 4294967295, %s1129_s17   ;;  %s818_s19 = sadd.s32 4294967294, %s1129_s17   ;;  %s1129_s17 = sphi %s1171_s17, %s20_s17   ;;  %s1125_s16 = sphi %s1169_s16, %s1476_s16   ;;  %s1121_s15 = sphi %s1167_s15, %s1475_s15   ;;  %s1117_s14 = sphi %s1165_s14, %s1474_s14   ;;  %s1113_s13 = sphi %s1163_s13, %s1473_s13   ;;  %s1109_s12 = sphi %s1161_s12, %s1472_s12  }
   0x8   : > { %p54_p0 = scmp.ne.s32.totalorder %s1113_s13, %s1109_s12  ;;  %p1195_p1 = scmp.eq.s32.totalorder %s817_s18, 0 }
   0x9   : > { %p1199_p2 = scmp.eq.s32.totalorder %s817_s18, 1  ;;  %p128_p3 = scmp.eq.s32.totalorder %s818_s19, 1 }
   0xa   : > { %s1459_s20 = scalar_select %p1195_p1, 1, 0 }
   0xb   : > { %p1205_p4 = por %p1195_p1, %p54_p0  ;;  %p819_p5 = scmp.ge.s32.totalorder %s1129_s17, 1 }
   0xc   : > { %p1210_p6 = por %p128_p3, %p54_p0  ;;  %p135_p7 = scmp.lt.s32.totalorder %s1129_s17, 3 }
   0xd   : > { %s1461_s22 = scalar_select %p1205_p4, 1, 0 }
   0xe   : > { %s1462_s23 = scalar_select %p1210_p6, 1, 0 }
   0xf   : > { %p1215_p8 = pnand %p819_p5, %p135_p7  ;;  %s1131_s25 = smov [#allocation5]  }
  0x10   : > { %s147_s26 = sshll.u32 %s1131_s25, 4  ;;  %s1132_s28 = smov [#allocation7]   ;;  %s1219_s26 = int_to_ptr.vmem [resolvable:$true] %s147_s26 }
  0x11   : > { %p870_p9 = pneg %p1215_p8  ;;  %s160_s29 = sshll.u32 %s1132_s28, 4  ;;  %s1230_s29 = int_to_ptr.vmem [resolvable:$true] %s160_s29 }
  0x12   : > { %s957_s5 = scalar_lea.hbm %s1452_s1, 1408 }
  0x13   : > { %p1226_p11 = pnand %p870_p9, %p1195_p1  ;;  %p958_p12 = scmp.ne.s32.totalorder %s1452_s1, %s957_s5 }
  0x14   : > { %p964_p5 = scmp.lt.u32.totalorder %s957_s5, %s1452_s1 }
  0x15   : > { %p959_p13 = pneg %p1226_p11 }
  0x17   : > { %p960_p0 = pnand %p959_p13, %p958_p12 }
  0x19   : > { %p961_p3 = pneg %p960_p0 }
  0x1b   : > { %p966_p7 = pnand %p964_p5, %p961_p3 }
  0x1d   : > { %969 = shalt.err (!%p966_p7)
}
  0x1e   : > { %s970_s10 = scalar_lea.vmem %s1219_s26, 1408  ;;  %p978_p1 = scmp.lt.s32.totalorder %s1219_s26, %s1219_s26 }
  0x1f   : > { %p971_p9 = scmp.ne.s32.totalorder %s1219_s26, %s970_s10  ;;  %p979_p12 = scmp.lt.s32.totalorder %s970_s10, %s970_s10 }
  0x21   : > { %p973_p10 = pnand %p971_p9, %p959_p13  ;;  %p980_p0 = por %p979_p12, %p978_p1 }
  0x23   : > { %p974_p6 = pneg %p973_p10 }
  0x25   : > { %p981_p4 = pnand %p980_p0, %p974_p6 }
  0x27   : > { %984 = shalt.err (!%p981_p4)
}
  0x28   : > { %s1133_s11 = smov 64   ;;  %s1134_s18 = smov 4  }
  0x29   : > { %873 = dma.hbm_to_vmem [thread:$0]  (!%p1226_p11), %s1452_s1, 1408, %s1219_s26, [#allocation6], %s1133_s11, %s1133_s11, %s1134_s18  }
  0x2a   : > { %s985_s4 = scalar_lea.hbm %s1453_s2, 5888 }
  0x2b   : > { %p986_p1 = scmp.ne.s32.totalorder %s1453_s2, %s985_s4  ;;  %p992_p10 = scmp.lt.u32.totalorder %s985_s4, %s1453_s2 }
  0x2d   : > { %p988_p4 = pnand %p986_p1, %p959_p13 }
  0x2f   : > { %p989_p6 = pneg %p988_p4 }
  0x31   : > { %p994_p3 = pnand %p992_p10, %p989_p6 }
  0x33   : > { %997 = shalt.err (!%p994_p3)
}
  0x34   : > { %s998_s26 = scalar_lea.vmem %s1230_s29, 5888  ;;  %p1006_p12 = scmp.lt.s32.totalorder %s1230_s29, %s1230_s29 }
  0x35   : > { %p999_p5 = scmp.ne.s32.totalorder %s1230_s29, %s998_s26  ;;  %p1007_p0 = scmp.lt.s32.totalorder %s998_s26, %s998_s26 }
  0x37   : > { %p1001_p7 = pnand %p999_p5, %p959_p13  ;;  %p1008_p1 = por %p1007_p0, %p1006_p12 }
  0x39   : > { %p1002_p9 = pneg %p1001_p7 }
  0x3b   : > { %p1009_p4 = pnand %p1008_p1, %p1002_p9 }
  0x3d   : > { %1012 = shalt.err (!%p1009_p4)
}
  0x3e   : > { %s1135_s9 = smov 256   ;;  %s1136_s10 = smov 16  }
  0x3f   : > { %876 = dma.hbm_to_vmem [thread:$0]  (!%p1226_p11), %s1453_s2, 5888, %s1230_s29, [#allocation6], %s1135_s9, %s1135_s9, %s1136_s10  }
  0x40   : > { %s32_s19 = sadd.s32 1, %s1125_s16  ;;  %s41_s25 = sadd.s32 1, %s1117_s14 }
  0x41   : > { %p34_p13 = scmp.ge.s32.totalorder %s32_s19, 2  ;;  %p48_p6 = scmp.ne.s32.totalorder %s1117_s14, %s1113_s13 }
  0x42   : > { %p49_p10 = scmp.eq.s32.totalorder %s1129_s17, 0  ;;  %p887_p3 = scmp.lt.s32.totalorder %s1129_s17, 2 }
  0x43   : > { %s1478_s19 = smov (%p34_p13, %s32_s19), 0  ;;  %p1294_p7 = por %p1199_p2, %p48_p6 }
  0x44   : > { %p50_p5 = por %p49_p10, %p48_p6  ;;  %s36_s27 = ssub.s32 %s1125_s16, %s1478_s19 }
  0x45   : > { %s1465_s28 = scalar_select %p1294_p7, 1, 0 }
  0x46   : > { %s174_s30 = sand.u32 1, %s1117_s14   ;;  %p39_p9 = scmp.eq.s32.totalorder %s36_s27, 0 }
  0x47   : > { %s823_s29 = sshll.u32 %s174_s30, 4  ;;  %s856_s4 = sshll.u32 %s1125_s16, 8 }
  0x48   : > { %s1303_s5 = scalar_select %p39_p9, %s1117_s14, %s41_s25  }
  0x49   : > { %s1308_s8 = scalar_lea.hbm %s1451_s0, %s856_s4  ;;  %s178_s21 = scalar_lea.vmem [#allocation2], %s823_s29 }
  0x4a   : > { %s188_s26 = sshll.u32 %s178_s21, 4  ;;  %p1312_p2 = pnand %p887_p3, %p50_p5  ;;  %s1316_s26 = int_to_ptr.vmem [resolvable:$true] %s188_s26 }
  0x4b   : > { %s175_s10 = scalar_lea.sflag [#allocation3], %s174_s30  ;;  %s1013_s11 = scalar_lea.hbm %s1308_s8, 256 }
  0x4c   : > { %p1014_p11 = scmp.ne.s32.totalorder %s1308_s8, %s1013_s11  ;;  %p1015_p12 = pneg %p1312_p2 }
  0x4d   : > { %s1018_s27 = scalar_lea.hbm %s1451_s0, 512  ;;  %p1019_p4 = scmp.lt.u32.totalorder %s1308_s8, %s1451_s0 }
  0x4e   : > { %p1016_p0 = pnand %p1015_p12, %p1014_p11  ;;  %p1020_p13 = scmp.lt.u32.totalorder %s1018_s27, %s1013_s11 }
  0x4f   : > { %p1022_p10 = scmp.lt.u32.totalorder %s1013_s11, %s1308_s8 }
  0x50   : > { %p1017_p1 = pneg %p1016_p0  ;;  %p1021_p6 = por %p1020_p13, %p1019_p4 }
  0x52   : > { %p1023_p3 = por %p1022_p10, %p1021_p6 }
  0x54   : > { %p1024_p5 = pnand %p1023_p3, %p1017_p1 }
  0x56   : > { %1027 = shalt.err (!%p1024_p5)
}
  0x57   : > { %s1028_s30 = scalar_lea.vmem %s1316_s26, 256  ;;  %s1137_s6 = smov [#allocation2]  }
  0x58   : > { %p1029_p9 = scmp.ne.s32.totalorder %s1316_s26, %s1028_s30  ;;  %s1033_s7 = sshll.u32 %s1137_s6, 4  ;;  %s1034_s7 = int_to_ptr.vmem [resolvable:$false] %s1033_s7 }
  0x59   : > { %s1035_s21 = scalar_lea.vmem %s1034_s7, 512  ;;  %p1036_p7 = scmp.lt.s32.totalorder %s1316_s26, %s1034_s7 }
  0x5a   : > { %p1031_p11 = pnand %p1029_p9, %p1015_p12  ;;  %p1037_p4 = scmp.lt.s32.totalorder %s1035_s21, %s1028_s30 }
  0x5c   : > { %p1032_p0 = pneg %p1031_p11  ;;  %p1038_p13 = por %p1037_p4, %p1036_p7 }
  0x5e   : > { %p1039_p6 = pnand %p1038_p13, %p1032_p0 }
  0x60   : > { %1042 = shalt.err (!%p1039_p6)
}
  0x61   : > { %880 = dma.hbm_to_vmem [thread:$0]  (!%p1312_p2), %s1308_s8, 256, %s1316_s26, %s175_s10  }
  0x62   : > { %197 = sbr.rel (%p1215_p8) target bundleno = 885 (0x375), region = 32  ;;  %s1346_s11 = sand.u32 (!%p1215_p8), 1, %s1113_s13  }
  0x63   : > { %s827_s18 = sshll.u32 (!%p1215_p8), %s1346_s11, 4  ;;  %s200_s25 = scalar_lea.sflag (!%p1215_p8), [#allocation3], %s1346_s11 }
  0x64   : > { %s203_s27 = scalar_lea.vmem (!%p1215_p8), [#allocation2], %s827_s18  ;;  %p1467_p7 = scmp.ne.s32.totalorder (!%p1215_p8), %s1461_s22, 0 }
  0x69   : > { %1096 = dma.done.wait (%p1467_p7), %s200_s25, 256  }
  0x6a   : > { %1098 = vsyncadd (%p1467_p7), %s200_s25, 4294967040  ;;  %p1468_p12 = scmp.ne.s32.totalorder %s1459_s20, 0 }
  0x6c   : > { %1100 = dma.done.wait (%p1468_p12), [#allocation6], 7296  }
  0x6d   : > { %1102 = vsyncadd (%p1468_p12), [#allocation6], 4294960000  ;;  %v1138_v0 = vmov 0   ;;  %v259_v1 = vld [vmem:[%s203_s27 + $0x8] sm:$0xff]  ;;  %vm373_vm0 = vcmask 1043456   ;;  %v258_v2 = vld [vmem:[%s203_s27] sm:$0xff] }
  0x6e   : > { %412 = vmatprep.mubr.bf16.mxu0 %v1138_v0  ;;  %569 = vmatprep.mubr.bf16.mxu1 %v1138_v0  ;;  %v261_v3 = vpack.c.bf16 %v259_v1, %v259_v1  ;;  %v260_v4 = vpack.c.bf16 %v258_v2, %v258_v2  ;;  %v947_v6 = vld [vmem:[#allocation5] sm:$0xff]   ;;  %vm348_vm1 = vcmask 64512   ;;  %v948_v7 = vld [vmem:[#allocation5 + $0x8] sm:$0xff]   ;;  %v949_v8 = vld [vmem:[#allocation5 + $0x10] sm:$0xff]   ;;  %vm598_vm2 = vcmask 261120   ;;  %s830_s20 = sshll.u32 %s1346_s11, 1 }
  0x6f   : > { %v950_v9 = vld [vmem:[#allocation5 + $0x18] sm:$0xff]   ;;  %v951_v10 = vld [vmem:[#allocation5 + $0x20] sm:$0xff]   ;;  %v952_v11 = vld [vmem:[#allocation5 + $0x28] sm:$0xff]   ;;  %s857_s22 = sshll.u32 %s1121_s15, 5  ;;  %s233_s24 = scalar_lea.vmem [#allocation8], %s830_s20 }
  0x70   : > { %839 = vmatprep.subr.msk.bf16.mxu0 %vm373_vm0, %v261_v3  ;;  %v375_v5 = vsel %vm373_vm0, %v260_v4, 0  ;;  %v953_v12 = vld [vmem:[#allocation5 + $0x30] sm:$0xff]   ;;  %v954_v13 = vld [vmem:[#allocation5 + $0x38] sm:$0xff]   ;;  %v264_v16 = vld [vmem:[#allocation7 + $0x10] sm:$0xff]  ;;  %s714_s8 = sshll.u32 %s233_s24, 4  ;;  %s1402_s10 = scalar_lea.hbm %s1454_s3, %s857_s22  ;;  %s1404_s8 = int_to_ptr.vmem [resolvable:$true] %s714_s8 }
  0x71   : > { %381 = vmatpush1.bf16.msra.mxu0 %v375_v5  ;;  %v262_v14 = vld [vmem:[#allocation7] sm:$0xff]  ;;  %v263_v17 = vld [vmem:[#allocation7 + $0x8] sm:$0xff]  ;;  %v265_v19 = vld [vmem:[#allocation7 + $0x18] sm:$0xff]  ;;  %s698_s29 = scalar_lea.sflag [#allocation4], %s1346_s11  ;;  %s1043_s4 = scalar_lea.vmem %s1404_s8, 32 }
  0x72   : > { %v266_v28 = vld [vmem:[#allocation7 + $0x20] sm:$0xff]  ;;  %v268_v30 = vld [vmem:[#allocation7 + $0x30] sm:$0xff]  ;;  %v267_v32 = vld [vmem:[#allocation7 + $0x28] sm:$0xff]  ;;  %p1044_p8 = scmp.ne.s32.totalorder %s1404_s8, %s1043_s4  ;;  %p1469_p2 = scmp.ne.s32.totalorder %s1465_s28, 0 }
  0x73   : > { %v269_v34 = vld [vmem:[#allocation7 + $0x38] sm:$0xff]  ;;  %v270_v44 = vld [vmem:[#allocation7 + $0x40] sm:$0xff]  ;;  %v272_v46 = vld [vmem:[#allocation7 + $0x50] sm:$0xff]  ;;  %s1140_s15 = smov [#allocation8]  }
  0x74   : > { %840 = vmatmul.mubr.msk.bf16.vlgmr.msra.gmra.mrb[0].mxu0 %vm348_vm1, %v947_v6  ;;  %v271_v48 = vld [vmem:[#allocation7 + $0x48] sm:$0xff]  ;;  %v273_v50 = vld [vmem:[#allocation7 + $0x58] sm:$0xff]  ;;  %v274_v60 = vld [vmem:[#allocation7 + $0x60] sm:$0xff]  ;;  %p1045_p1 = pnand %p1044_p8, %p1469_p2  ;;  %s1047_s30 = sshll.u32 %s1140_s15, 4  ;;  %s1048_s30 = int_to_ptr.vmem [resolvable:$false] %s1047_s30 }
  0x75   : > { %422 = vmatprep.mubr.bf16.mxu0 %v1138_v0  ;;  %v276_v62 = vld [vmem:[#allocation7 + $0x70] sm:$0xff]  ;;  %v275_v1 = vld [vmem:[#allocation7 + $0x68] sm:$0xff]  ;;  %v277_v3 = vld [vmem:[#allocation7 + $0x78] sm:$0xff]  ;;  %s1049_s6 = scalar_lea.vmem %s1048_s30, 64  ;;  %p1050_p3 = scmp.lt.s32.totalorder %s1404_s8, %s1048_s30 }
  0x76   : > { %p1046_p10 = pneg %p1045_p1  ;;  %p1051_p5 = scmp.lt.s32.totalorder %s1049_s6, %s1043_s4 }
  0x78   : > { %p1052_p9 = por %p1051_p5, %p1050_p3 }
  0x7a   : > { %p1053_p11 = pnand %p1052_p9, %p1046_p10 }
  0x7c   : > { %841 = vmatmul.mubr.msk.bf16.gmra.mrb[4].mxu0 %vm348_vm1, %v948_v7 }
  0x7d   : > { %432 = vmatprep.mubr.bf16.mxu0 %v1138_v0 }
  0x84   : > { %842 = vmatmul.mubr.msk.bf16.gmra.mrb[8].mxu0 %vm348_vm1, %v949_v8 }
  0x85   : > { %442 = vmatprep.mubr.bf16.mxu0 %v1138_v0 }
  0x8c   : > { %843 = vmatmul.mubr.msk.bf16.gmra.mrb[12].mxu0 %vm348_vm1, %v950_v9 }
  0x8d   : > { %452 = vmatprep.mubr.bf16.mxu0 %v1138_v0 }
  0x94   : > { %844 = vmatmul.mubr.msk.bf16.gmra.mrb[16].mxu0 %vm348_vm1, %v951_v10 }
  0x95   : > { %462 = vmatprep.mubr.bf16.mxu0 %v1138_v0 }
  0x9c   : > { %845 = vmatmul.mubr.msk.bf16.gmra.mrb[20].mxu0 %vm348_vm1, %v952_v11 }
  0x9d   : > { %472 = vmatprep.mubr.bf16.mxu0 %v1138_v0 }
  0xa4   : > { %846 = vmatmul.mubr.msk.bf16.gmra.mrb[24].mxu0 %vm348_vm1, %v953_v12 }
  0xa5   : > { %482 = vmatprep.mubr.bf16.mxu0 %v1138_v0 }
  0xac   : > { %847 = vmatmul.mubr.msk.bf16.gmra.mrb[28].mxu0 %vm348_vm1, %v954_v13  ;;  %v278_v13 = vld [vmem:[#allocation7 + $0x80] sm:$0xff] }
 0x147   : > { %v414_v15 = vpop.f32.mrb[0].mxu0 }
 0x148   : > { %v416_v18 = vpop.f32.mrb[1].mxu0  ;;  %v415_v21 = vadd.f32 %v414_v15, %v262_v14  ;;  %v280_v15 = vld [vmem:[#allocation7 + $0x90] sm:$0xff] }
 0x149   : > { %v418_v20 = vpop.f32.mrb[2].mxu0  ;;  %v417_v24 = vadd.f32 %v416_v18, %v263_v17  ;;  %v279_v17 = vld [vmem:[#allocation7 + $0x88] sm:$0xff] }
 0x14a   : > { %v419_v22 = vadd.f32 %v418_v20, %v264_v16  ;;  %v420_v23 = vpop.f32.mrb[3].mxu0 }
 0x14b   : > { %v421_v25 = vadd.f32 %v420_v23, %v265_v19  ;;  %v281_v19 = vld [vmem:[#allocation7 + $0x98] sm:$0xff] }
 0x14c   : > { %v493_v26 = vpack.c.bf16 %v419_v22, %v415_v21 }
 0x14d   : > { %v494_v27 = vpack.c.bf16 %v421_v25, %v417_v24 }
 0x14e   : > { %v509_v35 = vmax.bf16 %v1138_v0, %v493_v26 }
 0x14f   : > { %v424_v29 = vpop.f32.mrb[4].mxu0  ;;  %v510_v31 = vmax.bf16 %v1138_v0, %v494_v27 }
 0x150   : > { %v426_v33 = vpop.f32.mrb[5].mxu0  ;;  %v425_v37 = vadd.f32 %v424_v29, %v266_v28  ;;  %v282_v29 = vld [vmem:[#allocation7 + $0xa0] sm:$0xff] }
 0x151   : > { %v428_v36 = vpop.f32.mrb[6].mxu0  ;;  %537 = vmatprep.subr.bf16.mxu1 %v510_v31  ;;  %v427_v40 = vadd.f32 %v426_v33, %v267_v32  ;;  %v284_v31 = vld [vmem:[#allocation7 + $0xb0] sm:$0xff]  ;;  %v283_v33 = vld [vmem:[#allocation7 + $0xa8] sm:$0xff] }
 0x152   : > { %v429_v38 = vadd.f32 %v428_v36, %v268_v30  ;;  %v430_v39 = vpop.f32.mrb[7].mxu0  ;;  %538 = vmatpush1.bf16.msra.mxu1 %v509_v35  ;;  %v285_v35 = vld [vmem:[#allocation7 + $0xb8] sm:$0xff] }
 0x153   : > { %v431_v41 = vadd.f32 %v430_v39, %v269_v34 }
 0x154   : > { %v495_v42 = vpack.c.bf16 %v429_v38, %v425_v37 }
 0x155   : > { %v496_v43 = vpack.c.bf16 %v431_v41, %v427_v40 }
 0x156   : > { %v511_v51 = vmax.bf16 %v1138_v0, %v495_v42 }
 0x157   : > { %v434_v45 = vpop.f32.mrb[8].mxu0  ;;  %v512_v47 = vmax.bf16 %v1138_v0, %v496_v43 }
 0x158   : > { %v436_v49 = vpop.f32.mrb[9].mxu0  ;;  %v435_v53 = vadd.f32 %v434_v45, %v270_v44  ;;  %v286_v45 = vld [vmem:[#allocation7 + $0xc0] sm:$0xff] }
 0x159   : > { %v438_v52 = vpop.f32.mrb[10].mxu0  ;;  %539 = vmatprep.subr.bf16.mxu1 %v512_v47  ;;  %v437_v56 = vadd.f32 %v436_v49, %v271_v48  ;;  %v288_v47 = vld [vmem:[#allocation7 + $0xd0] sm:$0xff]  ;;  %v287_v49 = vld [vmem:[#allocation7 + $0xc8] sm:$0xff] }
 0x15a   : > { %v439_v54 = vadd.f32 %v438_v52, %v272_v46  ;;  %v440_v55 = vpop.f32.mrb[11].mxu0  ;;  %540 = vmatpush1.bf16.msra.mxu1 %v511_v51  ;;  %v289_v51 = vld [vmem:[#allocation7 + $0xd8] sm:$0xff] }
 0x15b   : > { %v441_v57 = vadd.f32 %v440_v55, %v273_v50 }
 0x15c   : > { %v497_v58 = vpack.c.bf16 %v439_v54, %v435_v53 }
 0x15d   : > { %v498_v59 = vpack.c.bf16 %v441_v57, %v437_v56 }
 0x15e   : > { %v513_v4 = vmax.bf16 %v1138_v0, %v497_v58 }
 0x15f   : > { %v444_v61 = vpop.f32.mrb[12].mxu0  ;;  %v514_v63 = vmax.bf16 %v1138_v0, %v498_v59 }
 0x160   : > { %v446_v2 = vpop.f32.mrb[13].mxu0  ;;  %v445_v6 = vadd.f32 %v444_v61, %v274_v60  ;;  %v290_v61 = vld [vmem:[#allocation7 + $0xe0] sm:$0xff] }
 0x161   : > { %v448_v5 = vpop.f32.mrb[14].mxu0  ;;  %541 = vmatprep.subr.bf16.mxu1 %v514_v63  ;;  %v447_v9 = vadd.f32 %v446_v2, %v275_v1  ;;  %v292_v63 = vld [vmem:[#allocation7 + $0xf0] sm:$0xff]  ;;  %v291_v2 = vld [vmem:[#allocation7 + $0xe8] sm:$0xff] }
 0x162   : > { %v449_v7 = vadd.f32 %v448_v5, %v276_v62  ;;  %v450_v8 = vpop.f32.mrb[15].mxu0  ;;  %542 = vmatpush1.bf16.msra.mxu1 %v513_v4  ;;  %v293_v4 = vld [vmem:[#allocation7 + $0xf8] sm:$0xff] }
 0x163   : > { %v451_v10 = vadd.f32 %v450_v8, %v277_v3 }
 0x164   : > { %v499_v11 = vpack.c.bf16 %v449_v7, %v445_v6 }
 0x165   : > { %v500_v12 = vpack.c.bf16 %v451_v10, %v447_v9 }
 0x166   : > { %v515_v20 = vmax.bf16 %v1138_v0, %v499_v11 }
 0x167   : > { %v454_v14 = vpop.f32.mrb[16].mxu0  ;;  %v516_v16 = vmax.bf16 %v1138_v0, %v500_v12 }
 0x168   : > { %v456_v18 = vpop.f32.mrb[17].mxu0  ;;  %v455_v22 = vadd.f32 %v454_v14, %v278_v13 }
 0x169   : > { %v458_v21 = vpop.f32.mrb[18].mxu0  ;;  %543 = vmatprep.subr.bf16.mxu1 %v516_v16  ;;  %v457_v25 = vadd.f32 %v456_v18, %v279_v17  ;;  %v955_v16 = vld [vmem:[#allocation5 + $0x40] sm:$0xff]   ;;  %v956_v17 = vld [vmem:[#allocation5 + $0x48] sm:$0xff]   ;;  %v294_v18 = vld [vmem:[#allocation7 + $0x100] sm:$0xff] }
 0x16a   : > { %v459_v23 = vadd.f32 %v458_v21, %v280_v15  ;;  %v460_v24 = vpop.f32.mrb[19].mxu0  ;;  %544 = vmatpush1.bf16.msra.mxu1 %v515_v20  ;;  %v296_v20 = vld [vmem:[#allocation7 + $0x110] sm:$0xff]  ;;  %v295_v21 = vld [vmem:[#allocation7 + $0x108] sm:$0xff] }
 0x16b   : > { %v461_v26 = vadd.f32 %v460_v24, %v281_v19 }
 0x16c   : > { %v501_v27 = vpack.c.bf16 %v459_v23, %v455_v22  ;;  %v297_v23 = vld [vmem:[#allocation7 + $0x118] sm:$0xff] }
 0x16d   : > { %v502_v28 = vpack.c.bf16 %v461_v26, %v457_v25 }
 0x16e   : > { %v517_v36 = vmax.bf16 %v1138_v0, %v501_v27 }
 0x16f   : > { %v464_v30 = vpop.f32.mrb[20].mxu0  ;;  %v518_v32 = vmax.bf16 %v1138_v0, %v502_v28 }
 0x170   : > { %v466_v34 = vpop.f32.mrb[21].mxu0  ;;  %v465_v38 = vadd.f32 %v464_v30, %v282_v29 }
 0x171   : > { %v468_v37 = vpop.f32.mrb[22].mxu0  ;;  %545 = vmatprep.subr.bf16.mxu1 %v518_v32  ;;  %v467_v41 = vadd.f32 %v466_v34, %v283_v33  ;;  %v298_v32 = vld [vmem:[#allocation7 + $0x120] sm:$0xff]  ;;  %v300_v34 = vld [vmem:[#allocation7 + $0x130] sm:$0xff] }
 0x172   : > { %v469_v39 = vadd.f32 %v468_v37, %v284_v31  ;;  %v470_v40 = vpop.f32.mrb[23].mxu0  ;;  %546 = vmatpush1.bf16.msra.mxu1 %v517_v36  ;;  %v299_v37 = vld [vmem:[#allocation7 + $0x128] sm:$0xff] }
 0x173   : > { %v471_v42 = vadd.f32 %v470_v40, %v285_v35 }
 0x174   : > { %v503_v43 = vpack.c.bf16 %v469_v39, %v465_v38  ;;  %v301_v39 = vld [vmem:[#allocation7 + $0x138] sm:$0xff] }
 0x175   : > { %v504_v44 = vpack.c.bf16 %v471_v42, %v467_v41 }
 0x176   : > { %v519_v52 = vmax.bf16 %v1138_v0, %v503_v43 }
 0x177   : > { %v474_v46 = vpop.f32.mrb[24].mxu0  ;;  %v520_v48 = vmax.bf16 %v1138_v0, %v504_v44 }
 0x178   : > { %v476_v50 = vpop.f32.mrb[25].mxu0  ;;  %v475_v54 = vadd.f32 %v474_v46, %v286_v45 }
 0x179   : > { %v478_v53 = vpop.f32.mrb[26].mxu0  ;;  %547 = vmatprep.subr.bf16.mxu1 %v520_v48  ;;  %v477_v57 = vadd.f32 %v476_v50, %v287_v49  ;;  %v257_v50 = vld [vmem:[#allocation5 + $0x50] sm:$0xf] }
 0x17a   : > { %v479_v55 = vadd.f32 %v478_v53, %v288_v47  ;;  %v480_v56 = vpop.f32.mrb[27].mxu0  ;;  %548 = vmatpush1.bf16.msra.mxu1 %v519_v52  ;;  %v303_v52 = vld [vmem:[#allocation7 + $0x148] sm:$0xff] }
 0x17b   : > { %v481_v58 = vadd.f32 %v480_v56, %v289_v51  ;;  %v302_v51 = vld [vmem:[#allocation7 + $0x140] sm:$0xff] }
 0x17c   : > { %v505_v59 = vpack.c.bf16 %v479_v55, %v475_v54  ;;  %v306_v56 = vld [vmem:[#allocation7 + $0x160] sm:$0xff] }
 0x17d   : > { %v506_v60 = vpack.c.bf16 %v481_v58, %v477_v57 }
 0x17e   : > { %v521_v5 = vmax.bf16 %v1138_v0, %v505_v59 }
 0x17f   : > { %v484_v62 = vpop.f32.mrb[28].mxu0  ;;  %v522_v1 = vmax.bf16 %v1138_v0, %v506_v60  ;;  %v660_v60 = vlaneseq }
 0x180   : > { %v486_v3 = vpop.f32.mrb[29].mxu0  ;;  %v485_v7 = vadd.f32 %v484_v62, %v290_v61  ;;  %v307_v61 = vld [vmem:[#allocation7 + $0x168] sm:$0xff] }
 0x181   : > { %v488_v6 = vpop.f32.mrb[30].mxu0  ;;  %549 = vmatprep.subr.bf16.mxu1 %v522_v1  ;;  %v487_v10 = vadd.f32 %v486_v3, %v291_v2  ;;  %v661_v3 = vshrl.u32 %v660_v60, 7  ;;  %vm694_vm3 = vcmp.lt.s32.totalorder %v660_v60, 256 }
 0x182   : > { %v489_v8 = vadd.f32 %v488_v6, %v292_v63  ;;  %v490_v9 = vpop.f32.mrb[31].mxu0  ;;  %550 = vmatpush1.bf16.msra.mxu1 %v521_v5 }
 0x183   : > { %v491_v11 = vadd.f32 %v490_v9, %v293_v4  ;;  %v305_v9 = vld [vmem:[#allocation7 + $0x150] ss:$8 sm:$0x3] }
 0x184   : > { %v507_v12 = vpack.c.bf16 %v489_v8, %v485_v7  ;;  %v662_v8 = vsub.s32 0, %v661_v3 }
 0x185   : > { %v508_v13 = vpack.c.bf16 %v491_v11, %v487_v10  ;;  %v666_v11 = vsub.s32 1, %v661_v3 }
 0x186   : > { %v523_v15 = vmax.bf16 %v1138_v0, %v507_v12 }
 0x187   : > { %v524_v14 = vmax.bf16 %v1138_v0, %v508_v13 }
 0x189   : > { %551 = vmatprep.subr.bf16.mxu1 %v524_v14  ;;  %v1139_v14 = vmov 1966171168  }
 0x18a   : > { %552 = vmatpush1.bf16.msra.mxu1 %v523_v15  ;;  %v678_v15 = vunpack.c.l.s4 %v1139_v14 }
 0x18d   : > { %570 = vmatmul.mubr.bf16.vlgmr.msra.gmra.mrb[0].mxu1 %v955_v16 }
 0x18e   : > { %579 = vmatprep.mubr.bf16.mxu1 %v1138_v0 }
 0x195   : > { %580 = vmatmul.mubr.bf16.gmra.mrb[4].mxu1 %v956_v17  ;;  %v663_v17 = vrot.slane %v305_v9, %v662_v8 }
 0x196   : > { %634 = vmatprep.mubr.bf16.mxu1 %v1138_v0 }
 0x260   : > { %v571_v19 = vpop.f32.mrb[0].mxu1 }
 0x261   : > { %v573_v22 = vpop.f32.mrb[1].mxu1  ;;  %v572_v25 = vadd.f32 %v571_v19, %v294_v18  ;;  %v667_v19 = vrot.slane %v305_v9, %v666_v11 }
 0x262   : > { %v575_v24 = vpop.f32.mrb[2].mxu1  ;;  %v574_v28 = vadd.f32 %v573_v22, %v295_v21  ;;  %v679_v22 = vunpack.c.0.s8 %v678_v15 }
 0x263   : > { %v576_v26 = vadd.f32 %v575_v24, %v296_v20  ;;  %v577_v27 = vpop.f32.mrb[3].mxu1 }
 0x264   : > { %v578_v29 = vadd.f32 %v577_v27, %v297_v23  ;;  %v682_v27 = vsub.s32 %v679_v22, %v661_v3 }
 0x265   : > { %v590_v30 = vpack.c.bf16 %v576_v26, %v572_v25 }
 0x266   : > { %v591_v31 = vpack.c.bf16 %v578_v29, %v574_v28 }
 0x267   : > { %v594_v36 = vmax.bf16 %v1138_v0, %v590_v30 }
 0x268   : > { %v581_v33 = vpop.f32.mrb[4].mxu1  ;;  %v595_v35 = vmax.bf16 %v1138_v0, %v591_v31 }
 0x269   : > { %v583_v38 = vpop.f32.mrb[5].mxu1  ;;  %v582_v41 = vadd.f32 %v581_v33, %v298_v32 }
 0x26a   : > { %v585_v40 = vpop.f32.mrb[6].mxu1  ;;  %602 = vmatprep.subr.bf16.mxu1 %v595_v35  ;;  %v584_v44 = vadd.f32 %v583_v38, %v299_v37 }
 0x26b   : > { %v586_v42 = vadd.f32 %v585_v40, %v300_v34  ;;  %v587_v43 = vpop.f32.mrb[7].mxu1  ;;  %603 = vmatpush1.bf16.msra.mxu1 %v594_v36 }
 0x26c   : > { %v588_v45 = vadd.f32 %v587_v43, %v301_v39 }
 0x26d   : > { %v592_v46 = vpack.c.bf16 %v586_v42, %v582_v41 }
 0x26e   : > { %v593_v47 = vpack.c.bf16 %v588_v45, %v584_v44 }
 0x26f   : > { %v596_v49 = vmax.bf16 %v1138_v0, %v592_v46 }
 0x270   : > { %v597_v48 = vmax.bf16 %v1138_v0, %v593_v47 }
 0x272   : > { %604 = vmatprep.subr.bf16.mxu1 %v597_v48 }
 0x273   : > { %605 = vmatpush1.bf16.msra.mxu1 %v596_v49 }
 0x276   : > { %850 = vmatmul.mubr.msk.bf16.vlgmr.msra.gmra.mrb[8].mxu1 %vm598_vm2, %v257_v50 }
 0x349   : > { %v636_v53 = vpop.f32.mrb[8].mxu1 }
 0x34a   : > { %v637_v54 = vadd.f32 %v636_v53, %v302_v51  ;;  %v638_v55 = vpop.f32.mrb[9].mxu1 }
 0x34b   : > { %v639_v57 = vadd.f32 %v638_v55, %v303_v52  ;;  %v640_v58 = vpop.f32.mrb[10].mxu1 }
 0x34c   : > { %v643_v59 = vmax.f32 %v637_v54, 0.0  ;;  %v641_v62 = vpop.f32.mrb[11].mxu1 }
 0x34d   : > { %v644_v63 = vmax.f32 %v639_v57, 0.0 }
 0x34e   : > { %v645_v1 = vmul.f32 %v643_v59, %v306_v56 }
 0x34f   : > { %v646_v0 = vmul.f32 %v644_v63, %v307_v61 }
 0x350   : > { %v647_v2 = vrot.slane %v645_v1, 4 }
 0x351   : > { %v653_v4 = vrot.slane %v646_v0, 4 }
 0x352   : > { %v648_v5 = vadd.f32 %v647_v2, %v645_v1 }
 0x353   : > { %v654_v6 = vadd.f32 %v653_v4, %v646_v0 }
 0x354   : > { %v649_v7 = vrot.slane %v648_v5, 2 }
 0x355   : > { %v655_v10 = vrot.slane %v654_v6, 2 }
 0x356   : > { %v650_v12 = vadd.f32 %v649_v7, %v648_v5 }
 0x357   : > { %v656_v13 = vadd.f32 %v655_v10, %v654_v6 }
 0x358   : > { %v651_v16 = vrot.slane %v650_v12, 1 }
 0x359   : > { %v657_v18 = vrot.slane %v656_v13, 1 }
 0x35a   : > { %v652_v20 = vadd.f32 %v651_v16, %v650_v12 }
 0x35b   : > { %v658_v21 = vadd.f32 %v657_v18, %v656_v13 }
 0x35c   : > { %v670_v23 = vadd.f32 %v663_v17, %v652_v20 }
 0x35d   : > { %v671_v24 = vadd.f32 %v667_v19, %v658_v21 }
 0x35e   : > { %v672_v25 = vmax.f32 %v670_v23, 0.0 }
 0x35f   : > { %v673_v26 = vmax.f32 %v671_v24, 0.0 }
 0x361   : > { %v676_v28 = vcombine.low %v672_v25, %v673_v26 }
 0x363   : > { %v683_v29 = vrot.slane %v676_v28, %v682_v27 }
 0x365   : > { %v690_v30 = vrot.slane %v683_v29, %v682_v27 }
 0x367   : > { %696 = vst.msk [vmem:[%s233_s24] sm:$0x3] %vm694_vm3, %v690_v30 }
 0x368   : > { %1056 = shalt.err (!%p1053_p11)
}
 0x369   : > { %s1057_s7 = scalar_lea.hbm %s1402_s10, 32  ;;  %s1061_s18 = scalar_lea.hbm %s1454_s3, 64 }
 0x36a   : > { %p1058_p0 = scmp.ne.s32.totalorder %s1402_s10, %s1057_s7  ;;  %p1062_p6 = scmp.lt.u32.totalorder %s1402_s10, %s1454_s3 }
 0x36b   : > { %p1063_p7 = scmp.lt.u32.totalorder %s1061_s18, %s1057_s7  ;;  %p1065_p8 = scmp.lt.u32.totalorder %s1057_s7, %s1402_s10 }
 0x36c   : > { %p1059_p4 = pnand %p1058_p0, %p1469_p2 }
 0x36d   : > { %p1064_p12 = por %p1063_p7, %p1062_p6 }
 0x36e   : > { %p1060_p13 = pneg %p1059_p4 }
 0x36f   : > { %p1066_p1 = por %p1065_p8, %p1064_p12 }
 0x371   : > { %p1067_p10 = pnand %p1066_p1, %p1060_p13 }
 0x373   : > { %1070 = shalt.err (!%p1067_p10)
}
 0x374   : > { %868 = dma.vmem_to_hbm [thread:$0]  (%p1469_p2), %s1404_s8, 32, %s1402_s10, %s698_s29  }
 0x375 PF: > { %s726_s20 = sand.u32 1, %s1109_s12   ;;  %p1470_p3 = scmp.ne.s32.totalorder %s1462_s23, 0 }
 0x376   : > { %p1471_p5 = scmp.ge.s32.totalorder %s1129_s17, 2  ;;  %s727_s22 = scalar_lea.sflag [#allocation4], %s726_s20 }
 0x378   : > { %p882_p9 = pnand %p1471_p5, %p1470_p3 }
 0x37a   : > { %1104 = dma.done.wait (!%p882_p9), %s727_s22, 32  }
 0x37b   : > { %1106 = vsyncadd (!%p882_p9), %s727_s22, 4294967264  ;;  %s20_s17 = sadd.s32 1, %s1129_s17   ;;  %s1472_s12 = smov %s1113_s13 }
 0x37c   : > { %p17_p11 = scmp.ge.s32.totalorder %s20_s17, 4   ;;  %s1473_s13 = smov %s1117_s14 }
 0x37d   : > { %s1474_s14 = smov %s1303_s5  ;;  %s1475_s15 = smov %s1125_s16 }
 0x37e   : > { %s1476_s16 = smov %s1478_s19  ;;  %19 = sbr.rel (!%p17_p11) target bundleno = 7 (0x7), region = 86 }
 0x385   :  { %732 = vsyncpa [#allocation3], 1 }
 0x386   :  { %734 = vsyncpa [#allocation3 + $0x1], 1 }
 0x387   :  { %735 = vsyncpa [#allocation6], 1 }
 0x388   :  { %736 = vsyncpa [#allocation4], 1 }
 0x389   :  { %738 = vsyncpa [#allocation4 + $0x1], 1 }

</bundles_post_ra>
